<compile_context>
chip_gen: v5e
topology: v5e:2x2
jax: 0.10.0
libtpu: 0.0.40
codegen_flags: <defaults>
</compile_context>

<pallas_src>
import functools

import jax
import jax.numpy as jnp
from jax.experimental import pallas as pl
from jax.experimental.pallas import tpu as pltpu


# ----------------------------------------------------------------------------
# Hardware query helpers
# ----------------------------------------------------------------------------
@functools.lru_cache(maxsize=1)
def _vmem_capacity_bytes():
    """Per-TensorCore VMEM capacity; conservative fallback if query fails."""
    try:
        return int(pltpu.get_tpu_info().vmem_capacity_bytes)
    except Exception:
        return 64 << 20  # v7x per-TC VMEM (smallest across generations)


def _derive_tm(hw, n_batch, f_g, f_l, f_int, in_itemsize, out_itemsize,
               vmem_cap, tm_cap=None):
    """Largest legal spatial tile that fits the VMEM budget.

    Per spatial column one grid step needs:
      2x (double-buffer) * (g + x + out tiles)  +  ~3*F_int f32 of live
      intermediates (acc / relu / psi).  Budget is half of VMEM, leaving room
      for weights and compiler slack.
    """
    per_col = (2 * (f_g * in_itemsize + f_l * in_itemsize + f_l * out_itemsize)
               + 3 * f_int * 4)
    budget = vmem_cap // 2
    tm = max(128, (budget // max(per_col, 1)) // 128 * 128)  # lane-aligned
    if tm_cap is not None:
        tm = min(tm, max(128, (tm_cap // 128) * 128))
    if tm >= hw:
        return hw  # full-extent block is always legal
    # Give the (up to 2) TensorCores and the DMA pipeline enough grid steps,
    # but never shrink below 2048 (v5e needs >=2048-wide tiles for the HBM
    # roofline; per-step overhead ~0.35us amortises best with big tiles).
    while n_batch * pl.cdiv(hw, tm) < 8 and tm >= 4096:
        tm //= 2
    return tm


# ----------------------------------------------------------------------------
# Kernel
# ----------------------------------------------------------------------------
def _attention_gate_kernel(g_ref, x_ref, wg_ref, wx_ref, b_ref, wpsi_ref,
                           bpsi_ref, out_ref, *, use_mxu):
    g = g_ref[...].astype(jnp.float32)            # (F_g, tm)
    x = x_ref[...].astype(jnp.float32)            # (F_l, tm)
    wg = wg_ref[...]                              # (F_int, F_g)
    wx = wx_ref[...]                              # (F_int, F_l)
    f_int = wg.shape[0]
    tm = g.shape[-1]

    if use_mxu:
        # Large channel counts: let the MXU do the contraction.
        acc = (jnp.dot(wg, g, preferred_element_type=jnp.float32)
               + jnp.dot(wx, x, preferred_element_type=jnp.float32)
               + b_ref[...])
    else:
        # Tiny channels: the MXU would run at <2% utilisation, so use unrolled
        # VPU broadcast-MACs.  Fused accumulator: seed with the combined
        # (bg+bx) bias and accumulate every term directly into it, so g1 and
        # x1 are never materialised as separate (F_int, tm) intermediates.
        acc = jnp.broadcast_to(b_ref[...], (f_int, tm))
        for k in range(wg.shape[1]):
            acc = acc + wg[:, k:k + 1] * g[k:k + 1, :]
        for k in range(wx.shape[1]):
            acc = acc + wx[:, k:k + 1] * x[k:k + 1, :]

    h = jnp.maximum(acc, 0.0)                     # (F_int, tm)

    # psi logit: sublane reduction -> lane-dense (1, tm); no N=1 MXU matmul.
    logit = jnp.sum(h * wpsi_ref[...], axis=0, keepdims=True) + bpsi_ref[...]
    # sigmoid = 1 / (1 + exp(-z)): exp and reciprocal both ride the EUP slot,
    # keeping the f32 divide off the (potentially saturated) VALU path.
    psi = pl.reciprocal(1.0 + jnp.exp(-logit), approx=True)  # (1, tm)

    # out = x * psi (psi broadcast over F_l sublanes — cheap).
    out_ref[...] = (x * psi).astype(out_ref.dtype)


# ----------------------------------------------------------------------------
# Wrapper
# ----------------------------------------------------------------------------
@functools.partial(jax.jit, static_argnames=("tm_cap",))
def attention_gate_pallas(g_nchw, x_nchw, wg, bg, wx, bx, wpsi, bpsi, *,
                          tm_cap=None):
    """Folded-BN AttentionGate forward.

    wg: (F_int, F_g), bg: (F_int,), wx: (F_int, F_l), bx: (F_int,),
    wpsi: (1, F_int), bpsi: (1,)   (all BN-folded, f32).
    """
    N, F_g, H, W = g_nchw.shape
    Nx, F_l, Hx, Wx = x_nchw.shape
    assert (N, H, W) == (Nx, Hx, Wx)
    F_int = wg.shape[0]
    HW = H * W

    in_sz = jnp.dtype(g_nchw.dtype).itemsize
    out_sz = jnp.dtype(x_nchw.dtype).itemsize
    vmem_cap = _vmem_capacity_bytes()
    tm = _derive_tm(HW, N, F_g, F_l, F_int, in_sz, out_sz, vmem_cap, tm_cap)

    # NCHW is already (N, C, H*W)-contiguous: pure reshape, no transpose.
    g_flat = g_nchw.reshape(N, F_g, HW)
    x_flat = x_nchw.reshape(N, F_l, HW)

    # Combine the two post-conv biases; shape params for the kernel layout.
    b_sum = (bg + bx).reshape(F_int, 1).astype(jnp.float32)
    wg_k = wg.astype(jnp.float32)
    wx_k = wx.astype(jnp.float32)
    wpsi_k = wpsi.reshape(F_int, 1).astype(jnp.float32)
    bpsi_k = bpsi.reshape(1, 1).astype(jnp.float32)

    # VPU vs MXU crossover is generation dependent (v6e/v7x pad the
    # contraction to 256, so the VPU path wins for longer); this static
    # threshold covers typical UNet attention-gate channel counts.
    use_mxu = max(F_g, F_l) > 32 or F_int > 128

    grid = (N, pl.cdiv(HW, tm))

    # Scoped-VMEM estimate: real double-buffered g/x/out tiles + intermediates
    # + weights.  Only raise the limit when the default (16 MiB on v5e) is too
    # small, and clamp to ~75% of this chip's physical per-TC VMEM (64 MiB on
    # v7x, 128 MiB on v5e/v6e).
    weight_bytes = 4 * (F_int * F_g + F_int * F_l + 2 * F_int + 2)
    est = (2 * tm * (F_g * in_sz + F_l * in_sz + F_l * out_sz)
           + 3 * F_int * tm * 4 + weight_bytes + (1 << 20))
    cp_kwargs = dict(dimension_semantics=("parallel", "parallel"))
    if est > (16 << 20):
        cp_kwargs["vmem_limit_bytes"] = int(min(est, vmem_cap * 3 // 4))

    kernel = functools.partial(_attention_gate_kernel, use_mxu=use_mxu)

    out_flat = pl.pallas_call(
        kernel,
        out_shape=jax.ShapeDtypeStruct((N, F_l, HW), x_nchw.dtype),
        grid_spec=pltpu.PrefetchScalarGridSpec(
            num_scalar_prefetch=0,
            grid=grid,
            in_specs=[
                pl.BlockSpec((None, F_g, tm), lambda n, i: (n, 0, i)),  # g
                pl.BlockSpec((None, F_l, tm), lambda n, i: (n, 0, i)),  # x
                pl.BlockSpec((F_int, F_g), lambda n, i: (0, 0)),        # W_g
                pl.BlockSpec((F_int, F_l), lambda n, i: (0, 0)),        # W_x
                pl.BlockSpec((F_int, 1), lambda n, i: (0, 0)),          # bg+bx
                pl.BlockSpec((F_int, 1), lambda n, i: (0, 0)),          # W_psi
                pl.BlockSpec((1, 1), lambda n, i: (0, 0)),              # b_psi
            ],
            out_specs=pl.BlockSpec((None, F_l, tm), lambda n, i: (n, 0, i)),
        ),
        compiler_params=pltpu.CompilerParams(**cp_kwargs),
    )(g_flat, x_flat, wg_k, wx_k, b_sum, wpsi_k, bpsi_k)

    return out_flat.reshape(N, F_l, H, W)


# ----------------------------------------------------------------------------
# Parameter construction (BN folding) and pure-JAX reference
# ----------------------------------------------------------------------------
def _fold_bn(w, b, gamma, beta, mean, var, eps=1e-5):
    """Fold eval-mode BatchNorm into a preceding 1x1 conv.

    w : (C_out, C_in), b : (C_out,)  ->  folded (w', b') same shapes.
    """
    scale = gamma / jnp.sqrt(var + eps)
    return (w * scale[:, None]).astype(jnp.float32), \
           ((b - mean) * scale + beta).astype(jnp.float32)


def _make_params(key, F_g, F_l, F_int):
    ks = jax.random.split(key, 12)
    # Conv weights in PyTorch are (C_out, C_in, 1, 1); keep them as (C_out, C_in).
    wg = jax.random.normal(ks[0], (F_int, F_g), jnp.float32) * 0.1
    bg = jax.random.normal(ks[1], (F_int,), jnp.float32) * 0.1
    wx = jax.random.normal(ks[2], (F_int, F_l), jnp.float32) * 0.1
    bx = jax.random.normal(ks[3], (F_int,), jnp.float32) * 0.1
    wpsi = jax.random.normal(ks[4], (1, F_int), jnp.float32) * 0.1
    bpsi = jax.random.normal(ks[5], (1,), jnp.float32) * 0.1

    def bn(kg, kb, c):
        gamma = 1.0 + 0.1 * jax.random.normal(kg, (c,), jnp.float32)
        beta = 0.1 * jax.random.normal(kb, (c,), jnp.float32)
        mean = 0.05 * jnp.arange(c, dtype=jnp.float32)
        var = 1.0 + 0.1 * jnp.arange(c, dtype=jnp.float32)
        return gamma, beta, mean, var

    wg_f, bg_f = _fold_bn(wg, bg, *bn(ks[6], ks[7], F_int))
    wx_f, bx_f = _fold_bn(wx, bx, *bn(ks[8], ks[9], F_int))
    wpsi_f, bpsi_f = _fold_bn(wpsi, bpsi, *bn(ks[10], ks[11], 1))
    return wg_f, bg_f, wx_f, bx_f, wpsi_f, bpsi_f


def _reference(g, x, wg, bg, wx, bx, wpsi, bpsi):
    # Pure-JAX reference of the same (BN-folded, eval-mode) forward pass.
    g1 = jnp.einsum('oc,nchw->nohw', wg, g) + bg[None, :, None, None]
    x1 = jnp.einsum('oc,nchw->nohw', wx, x) + bx[None, :, None, None]
    h = jnp.maximum(g1 + x1, 0.0)
    psi = jax.nn.sigmoid(
        jnp.einsum('oc,nchw->nohw', wpsi, h) + bpsi[None, :, None, None])
    return x * psi


if __name__ == "__main__":
    key = jax.random.PRNGKey(0)

    # Tolerances cover the EUP approximate-reciprocal sigmoid (out error is
    # relative to |out| itself and bounded by the vrcp rel-error, <~1e-3).
    ATOL = RTOL = 5e-3

    # Test 1: small shapes matching the module spec (full-extent spatial block).
    N, F_g, F_l, F_int, H, W = 2, 4, 4, 8, 16, 16
    kg, kx, kp = jax.random.split(key, 3)
    g = jax.random.normal(kg, (N, F_g, H, W), jnp.float32)
    x = jax.random.normal(kx, (N, F_l, H, W), jnp.float32)
    params = _make_params(kp, F_g, F_l, F_int)

    out = jax.block_until_ready(attention_gate_pallas(g, x, *params))
    ref = _reference(g, x, *params)
    assert out.shape == (N, F_l, H, W)
    assert jnp.allclose(out, ref, atol=ATOL, rtol=RTOL), "mismatch vs reference"

    # Test 2: larger spatial extent, evenly dividing tile -> grid (2, 2).
    H2 = W2 = 32
    kg2, kx2 = jax.random.split(kg, 2)
    g2 = jax.random.normal(kg2, (N, F_g, H2, W2), jnp.float32)
    x2 = jax.random.normal(kx2, (N, F_l, H2, W2), jnp.float32)
    ref2 = _reference(g2, x2, *params)
    out2 = jax.block_until_ready(
        attention_gate_pallas(g2, x2, *params, tm_cap=512))
    assert jnp.allclose(out2, ref2, atol=ATOL, rtol=RTOL), "mismatch (tiled)"

    # Test 3: non-dividing tile exercises the cdiv grid / partial boundary
    # block (HW=1024, tm=384 -> 3 spatial steps, last one partial).
    out3 = jax.block_until_ready(
        attention_gate_pallas(g2, x2, *params, tm_cap=384))
    assert jnp.allclose(out3, ref2, atol=ATOL, rtol=RTOL), "mismatch (cdiv)"

    print("KERNEL_OK")
</pallas_src>

<mosaic_0001>
module attributes {stable_mosaic.version = 11 : i64} {
  func.func @_attention_gate_kernel(%arg0: i32, %arg1: i32, %arg2: memref<1x4x256xf32, #tpu.memory_space<vmem>>, %arg3: memref<1x4x256xf32, #tpu.memory_space<vmem>>, %arg4: memref<8x4xf32, #tpu.memory_space<vmem>>, %arg5: memref<8x4xf32, #tpu.memory_space<vmem>>, %arg6: memref<8x1xf32, #tpu.memory_space<vmem>>, %arg7: memref<8x1xf32, #tpu.memory_space<vmem>>, %arg8: memref<1x1xf32, #tpu.memory_space<vmem>>, %arg9: memref<1x4x256xf32, #tpu.memory_space<vmem>>) attributes {dimension_semantics = [#tpu.dimension_semantics<parallel>, #tpu.dimension_semantics<parallel>], iteration_bounds = array<i64: 2, 1>, scalar_prefetch = 0 : i64, scratch_operands = 0 : i64, tpu.core_type = #tpu.core_type<tc>, window_params = [{transform_indices = @transform_0, window_bounds = array<i64: 1, 4, 256>}, {transform_indices = @transform_1, window_bounds = array<i64: 1, 4, 256>}, {pipeline_mode = #tpu.pipeline_mode<synchronous>, transform_indices = @transform_2, window_bounds = array<i64: 8, 4>}, {pipeline_mode = #tpu.pipeline_mode<synchronous>, transform_indices = @transform_3, window_bounds = array<i64: 8, 4>}, {pipeline_mode = #tpu.pipeline_mode<synchronous>, transform_indices = @transform_4, window_bounds = array<i64: 8, 1>}, {pipeline_mode = #tpu.pipeline_mode<synchronous>, transform_indices = @transform_5, window_bounds = array<i64: 8, 1>}, {pipeline_mode = #tpu.pipeline_mode<synchronous>, transform_indices = @transform_6, window_bounds = array<i64: 1, 1>}, {transform_indices = @transform_7, window_bounds = array<i64: 1, 4, 256>}]} {
    %c0 = arith.constant 0 : index
    %c0_0 = arith.constant 0 : index
    %c0_1 = arith.constant 0 : index
    %0 = vector.load %arg2[%c0, %c0_0, %c0_1] : memref<1x4x256xf32, #tpu.memory_space<vmem>>, vector<1x4x256xf32>
    %1 = vector.shape_cast %0 : vector<1x4x256xf32> to vector<4x256xf32>
    %c0_2 = arith.constant 0 : index
    %c0_3 = arith.constant 0 : index
    %c0_4 = arith.constant 0 : index
    %2 = vector.load %arg3[%c0_2, %c0_3, %c0_4] : memref<1x4x256xf32, #tpu.memory_space<vmem>>, vector<1x4x256xf32>
    %3 = vector.shape_cast %2 : vector<1x4x256xf32> to vector<4x256xf32>
    %c0_5 = arith.constant 0 : index
    %c0_6 = arith.constant 0 : index
    %4 = vector.load %arg4[%c0_5, %c0_6] : memref<8x4xf32, #tpu.memory_space<vmem>>, vector<8x4xf32>
    %c0_7 = arith.constant 0 : index
    %c0_8 = arith.constant 0 : index
    %5 = vector.load %arg5[%c0_7, %c0_8] : memref<8x4xf32, #tpu.memory_space<vmem>>, vector<8x4xf32>
    %c0_9 = arith.constant 0 : index
    %c0_10 = arith.constant 0 : index
    %6 = vector.load %arg6[%c0_9, %c0_10] : memref<8x1xf32, #tpu.memory_space<vmem>>, vector<8x1xf32>
    %7 = vector.shape_cast %6 : vector<8x1xf32> to vector<8x1xf32>
    %8 = vector.broadcast %7 : vector<8x1xf32> to vector<8x256xf32>
    %9 = vector.extract_strided_slice %4 {offsets = [0, 0], sizes = [8, 1], strides = [1, 1]} : vector<8x4xf32> to vector<8x1xf32>
    %10 = vector.extract_strided_slice %1 {offsets = [0, 0], sizes = [1, 256], strides = [1, 1]} : vector<4x256xf32> to vector<1x256xf32>
    %11 = vector.broadcast %9 : vector<8x1xf32> to vector<8x256xf32>
    %12 = vector.broadcast %10 : vector<1x256xf32> to vector<8x256xf32>
    %13 = arith.mulf %11, %12 : vector<8x256xf32>
    %14 = arith.addf %8, %13 : vector<8x256xf32>
    %15 = vector.extract_strided_slice %4 {offsets = [0, 1], sizes = [8, 1], strides = [1, 1]} : vector<8x4xf32> to vector<8x1xf32>
    %16 = vector.extract_strided_slice %1 {offsets = [1, 0], sizes = [1, 256], strides = [1, 1]} : vector<4x256xf32> to vector<1x256xf32>
    %17 = vector.broadcast %15 : vector<8x1xf32> to vector<8x256xf32>
    %18 = vector.broadcast %16 : vector<1x256xf32> to vector<8x256xf32>
    %19 = arith.mulf %17, %18 : vector<8x256xf32>
    %20 = arith.addf %14, %19 : vector<8x256xf32>
    %21 = vector.extract_strided_slice %4 {offsets = [0, 2], sizes = [8, 1], strides = [1, 1]} : vector<8x4xf32> to vector<8x1xf32>
    %22 = vector.extract_strided_slice %1 {offsets = [2, 0], sizes = [1, 256], strides = [1, 1]} : vector<4x256xf32> to vector<1x256xf32>
    %23 = vector.broadcast %21 : vector<8x1xf32> to vector<8x256xf32>
    %24 = vector.broadcast %22 : vector<1x256xf32> to vector<8x256xf32>
    %25 = arith.mulf %23, %24 : vector<8x256xf32>
    %26 = arith.addf %20, %25 : vector<8x256xf32>
    %27 = vector.extract_strided_slice %4 {offsets = [0, 3], sizes = [8, 1], strides = [1, 1]} : vector<8x4xf32> to vector<8x1xf32>
    %28 = vector.extract_strided_slice %1 {offsets = [3, 0], sizes = [1, 256], strides = [1, 1]} : vector<4x256xf32> to vector<1x256xf32>
    %29 = vector.broadcast %27 : vector<8x1xf32> to vector<8x256xf32>
    %30 = vector.broadcast %28 : vector<1x256xf32> to vector<8x256xf32>
    %31 = arith.mulf %29, %30 : vector<8x256xf32>
    %32 = arith.addf %26, %31 : vector<8x256xf32>
    %33 = vector.extract_strided_slice %5 {offsets = [0, 0], sizes = [8, 1], strides = [1, 1]} : vector<8x4xf32> to vector<8x1xf32>
    %34 = vector.extract_strided_slice %3 {offsets = [0, 0], sizes = [1, 256], strides = [1, 1]} : vector<4x256xf32> to vector<1x256xf32>
    %35 = vector.broadcast %33 : vector<8x1xf32> to vector<8x256xf32>
    %36 = vector.broadcast %34 : vector<1x256xf32> to vector<8x256xf32>
    %37 = arith.mulf %35, %36 : vector<8x256xf32>
    %38 = arith.addf %32, %37 : vector<8x256xf32>
    %39 = vector.extract_strided_slice %5 {offsets = [0, 1], sizes = [8, 1], strides = [1, 1]} : vector<8x4xf32> to vector<8x1xf32>
    %40 = vector.extract_strided_slice %3 {offsets = [1, 0], sizes = [1, 256], strides = [1, 1]} : vector<4x256xf32> to vector<1x256xf32>
    %41 = vector.broadcast %39 : vector<8x1xf32> to vector<8x256xf32>
    %42 = vector.broadcast %40 : vector<1x256xf32> to vector<8x256xf32>
    %43 = arith.mulf %41, %42 : vector<8x256xf32>
    %44 = arith.addf %38, %43 : vector<8x256xf32>
    %45 = vector.extract_strided_slice %5 {offsets = [0, 2], sizes = [8, 1], strides = [1, 1]} : vector<8x4xf32> to vector<8x1xf32>
    %46 = vector.extract_strided_slice %3 {offsets = [2, 0], sizes = [1, 256], strides = [1, 1]} : vector<4x256xf32> to vector<1x256xf32>
    %47 = vector.broadcast %45 : vector<8x1xf32> to vector<8x256xf32>
    %48 = vector.broadcast %46 : vector<1x256xf32> to vector<8x256xf32>
    %49 = arith.mulf %47, %48 : vector<8x256xf32>
    %50 = arith.addf %44, %49 : vector<8x256xf32>
    %51 = vector.extract_strided_slice %5 {offsets = [0, 3], sizes = [8, 1], strides = [1, 1]} : vector<8x4xf32> to vector<8x1xf32>
    %52 = vector.extract_strided_slice %3 {offsets = [3, 0], sizes = [1, 256], strides = [1, 1]} : vector<4x256xf32> to vector<1x256xf32>
    %53 = vector.broadcast %51 : vector<8x1xf32> to vector<8x256xf32>
    %54 = vector.broadcast %52 : vector<1x256xf32> to vector<8x256xf32>
    %55 = arith.mulf %53, %54 : vector<8x256xf32>
    %56 = arith.addf %50, %55 : vector<8x256xf32>
    %cst = arith.constant 0.000000e+00 : f32
    %57 = vector.broadcast %cst : f32 to vector<8x256xf32>
    %58 = arith.maximumf %56, %57 : vector<8x256xf32>
    %c0_11 = arith.constant 0 : index
    %c0_12 = arith.constant 0 : index
    %59 = vector.load %arg7[%c0_11, %c0_12] : memref<8x1xf32, #tpu.memory_space<vmem>>, vector<8x1xf32>
    %60 = vector.broadcast %59 : vector<8x1xf32> to vector<8x256xf32>
    %61 = arith.mulf %58, %60 : vector<8x256xf32>
    %cst_13 = arith.constant dense<0.000000e+00> : vector<256xf32>
    %62 = vector.multi_reduction <add>, %61, %cst_13 [0] : vector<8x256xf32> to vector<256xf32>
    %63 = vector.shape_cast %62 : vector<256xf32> to vector<1x256xf32>
    %c0_14 = arith.constant 0 : index
    %c0_15 = arith.constant 0 : index
    %64 = vector.load %arg8[%c0_14, %c0_15] : memref<1x1xf32, #tpu.memory_space<vmem>>, vector<1x1xf32>
    %65 = vector.broadcast %64 : vector<1x1xf32> to vector<1x256xf32>
    %66 = arith.addf %63, %65 : vector<1x256xf32>
    %cst_16 = arith.constant 0.000000e+00 : f32
    %67 = vector.broadcast %cst_16 : f32 to vector<1x256xf32>
    %68 = arith.subf %67, %66 : vector<1x256xf32>
    %69 = math.exp %68 : vector<1x256xf32>
    %cst_17 = arith.constant 1.000000e+00 : f32
    %70 = vector.broadcast %cst_17 : f32 to vector<1x256xf32>
    %71 = arith.addf %70, %69 : vector<1x256xf32>
    %72 = tpu.reciprocal %71 {approx = true} : vector<1x256xf32> -> vector<1x256xf32>
    %73 = vector.broadcast %72 : vector<1x256xf32> to vector<4x256xf32>
    %74 = arith.mulf %3, %73 : vector<4x256xf32>
    %c0_18 = arith.constant 0 : index
    %c0_19 = arith.constant 0 : index
    %c0_20 = arith.constant 0 : index
    %75 = vector.load %arg9[%c0_18, %c0_19, %c0_20] : memref<1x4x256xf32, #tpu.memory_space<vmem>>, vector<1x4x256xf32>
    %76 = vector.shape_cast %75 : vector<1x4x256xf32> to vector<4x256xf32>
    %77 = vector.shape_cast %74 : vector<4x256xf32> to vector<1x4x256xf32>
    tpu.vector_store %arg9[%c0_18, %c0_19, %c0_20], %77 {strides = array<i32>} : memref<1x4x256xf32, #tpu.memory_space<vmem>>, vector<1x4x256xf32>,
    return
  }
  func.func @transform_0(%arg0: i32, %arg1: i32) -> (i32, i32, i32) {
    %c0_i32 = arith.constant 0 : i32
    %c0_i32_0 = arith.constant 0 : i32
    return %arg0, %c0_i32, %arg1 : i32, i32, i32
  }
  func.func @transform_1(%arg0: i32, %arg1: i32) -> (i32, i32, i32) {
    %c0_i32 = arith.constant 0 : i32
    %c0_i32_0 = arith.constant 0 : i32
    return %arg0, %c0_i32, %arg1 : i32, i32, i32
  }
  func.func @transform_2(%arg0: i32, %arg1: i32) -> (i32, i32) {
    %c0_i32 = arith.constant 0 : i32
    %c0_i32_0 = arith.constant 0 : i32
    %c0_i32_1 = arith.constant 0 : i32
    return %c0_i32, %c0_i32_0 : i32, i32
  }
  func.func @transform_3(%arg0: i32, %arg1: i32) -> (i32, i32) {
    %c0_i32 = arith.constant 0 : i32
    %c0_i32_0 = arith.constant 0 : i32
    %c0_i32_1 = arith.constant 0 : i32
    return %c0_i32, %c0_i32_0 : i32, i32
  }
  func.func @transform_4(%arg0: i32, %arg1: i32) -> (i32, i32) {
    %c0_i32 = arith.constant 0 : i32
    %c0_i32_0 = arith.constant 0 : i32
    %c0_i32_1 = arith.constant 0 : i32
    return %c0_i32, %c0_i32_0 : i32, i32
  }
  func.func @transform_5(%arg0: i32, %arg1: i32) -> (i32, i32) {
    %c0_i32 = arith.constant 0 : i32
    %c0_i32_0 = arith.constant 0 : i32
    %c0_i32_1 = arith.constant 0 : i32
    return %c0_i32, %c0_i32_0 : i32, i32
  }
  func.func @transform_6(%arg0: i32, %arg1: i32) -> (i32, i32) {
    %c0_i32 = arith.constant 0 : i32
    %c0_i32_0 = arith.constant 0 : i32
    %c0_i32_1 = arith.constant 0 : i32
    return %c0_i32, %c0_i32_0 : i32, i32
  }
  func.func @transform_7(%arg0: i32, %arg1: i32) -> (i32, i32, i32) {
    %c0_i32 = arith.constant 0 : i32
    %c0_i32_0 = arith.constant 0 : i32
    return %arg0, %c0_i32, %arg1 : i32, i32, i32
  }
}

</mosaic_0001>

<bundles_post_ra>
// kernel: attention_gate_pallas.1
= control target key start
LH: loop header
LB: loop body
LE: loop exit
PB: predicated region body
PF: predicated region fallthrough
CT: control target
= control target key end

     0   :  { %s769_s26 = smov 0   ;;  %s771_s27 = smov 0   ;;  %s837_s0 = inlined_call_operand.vmem [shape: f32[2,4,256], index: 0, kind: input, shape index: {}]   ;;  %s838_s1 = inlined_call_operand.vmem [shape: f32[2,4,256], index: 1, kind: input, shape index: {}]   ;;  %s839_s2 = inlined_call_operand.vmem [shape: f32[8,4], index: 2, kind: input, shape index: {}]   ;;  %s840_s3 = inlined_call_operand.vmem [shape: f32[8,4], index: 3, kind: input, shape index: {}]   ;;  %s841_s4 = inlined_call_operand.vmem [shape: f32[8,1], index: 4, kind: input, shape index: {}]   ;;  %s842_s5 = inlined_call_operand.vmem [shape: f32[8,1], index: 5, kind: input, shape index: {}]   ;;  %s843_s6 = inlined_call_operand.<no memory space> [shape: f32[1,1], index: 6, kind: input, shape index: {}]   ;;  %s844_s7 = inlined_call_operand.vmem [shape: f32[2,4,256], index: 7, kind: output, shape index: {}]  }
   0x1   :  { %v12_v0 = vstv %s843_s6  ;;  %s773_s28 = smov 0  }
   0x2   :  { %13 = vst [vmem:[#allocation2] sm:$0x1] %v12_v0 }
   0x3 LB: > { %s31_s6 = sadd.s32 1, %s716_s27  ;;  %p640_p0 = scmp.ge.s32.totalorder %s720_s28, 1  ;;  %s720_s28 = sphi %s773_s28, %s19_s28   ;;  %s716_s27 = sphi %s771_s27, %s846_s27   ;;  %s712_s26 = sphi %s769_s26, %s845_s26  }
   0x4   : > { %p33_p1 = scmp.ge.s32.totalorder %s31_s6, 2  ;;  %p277_p2 = scmp.lt.s32.totalorder %s720_s28, 3 }
   0x6   : > { %s848_s6 = smov (%p33_p1, %s31_s6), 0  ;;  %p278_p3 = pnand %p640_p0, %p277_p2 }
   0x7   : > { %p327_p4 = scmp.lt.s32.totalorder (!%p278_p3), %s712_s26, 1 }
   0x8   : > { %281 = sbr.rel (%p278_p3) target bundleno = 200 (0xc8), region = 48 }
   0xd   : > { %v358_v1 = vld [vmem:[%s839_s2] sm:$0xff]  ;;  %v722_v2 = vmov 1   ;;  %v723_v3 = vmov 0   ;;  %v724_v4 = vmov 3   ;;  %v725_v6 = vmov 2   ;;  %s850_s26 = smov (!%p327_p4, %s712_s26), 1 }
   0xe   : > { %681 = vset.pattern.permute.xlu1 %v722_v2  ;;  %680 = vset.pattern.permute.xlu0 %v723_v3  ;;  %v360_v5 = vld [vmem:[%s841_s4] sm:$0xff]  ;;  %s803_s14 = sshll.u32 %s850_s26, 3  ;;  %vm526_vm0 = vcmask 1043456  }
   0xf   : > { %383 = vperm.xlu1 %681, %v358_v1   ;;  %368 = vperm.xlu0 %680, %v358_v1   ;;  %v359_v7 = vld [vmem:[%s840_s3] sm:$0xff]  ;;  %s334_s17 = scalar_lea.vmem %s837_s0, %s803_s14  ;;  %s344_s20 = scalar_lea.vmem %s838_s1, %s803_s14 }
  0x10   : > { %683 = vset.pattern.permute.xlu2 %v724_v4  ;;  %v484_v8 = vld [vmem:[%s842_s5] sm:$0xff]  ;;  %s354_s23 = scalar_lea.vmem %s844_s7, %s803_s14 }
  0x11   : > { %411 = vperm.xlu2 %683, %v358_v1   ;;  %v504_v9 = vld [vmem:[#allocation2] sm:$0x1] }
  0x12   : > { %v356_v10 = vld [vmem:[%s334_s17] sm:$0xff] }
  0x13   : > { %v372_v12 = vperm.slane %v356_v10, 0  ;;  %v373_v13 = vperm.slane %v356_v10, 4  ;;  %v386_v16 = vperm.slane %v356_v10, 1  ;;  %v387_v17 = vperm.slane %v356_v10, 5  ;;  %v813_v18 = vld [vmem:[%s344_s20] sm:$0xff] }
  0x14   : > { %v400_v19 = vperm.slane %v356_v10, 2  ;;  %v401_v20 = vperm.slane %v356_v10, 6  ;;  %v414_v23 = vperm.slane %v356_v10, 3  ;;  %v415_v24 = vperm.slane %v356_v10, 7 }
  0x15   : > { %v376_v21 = vperm.slane %v372_v12, 0  ;;  %v377_v22 = vperm.slane %v373_v13, 0  ;;  %v430_v25 = vperm.slane %v813_v18, 0  ;;  %v431_v26 = vperm.slane %v813_v18, 4 }
  0x16   : > { %v390_v27 = vperm.slane %v386_v16, 1  ;;  %v391_v28 = vperm.slane %v387_v17, 1  ;;  %v404_v29 = vperm.slane %v400_v19, 2  ;;  %v405_v30 = vperm.slane %v401_v20, 2 }
  0x17   : > { %682 = vset.pattern.permute.xlu1 %v725_v6  ;;  %363 = vperm.xlu0 %680, %v360_v5   ;;  %v418_v34 = vperm.slane %v414_v23, 3  ;;  %v419_v35 = vperm.slane %v415_v24, 3  ;;  %v434_v37 = vperm.slane %v430_v25, 0  ;;  %v435_v38 = vperm.slane %v431_v26, 0 }
  0x18   : > { %397 = vperm.xlu1 %682, %v358_v1   ;;  %v444_v46 = vperm.slane %v813_v18, 1  ;;  %v445_v47 = vperm.slane %v813_v18, 5  ;;  %v472_v50 = vperm.slane %v813_v18, 3  ;;  %v473_v51 = vperm.slane %v813_v18, 7 }
  0x19   : > { %684 = vset.pattern.permute.xlu2 %v723_v3  ;;  %v458_v52 = vperm.slane %v813_v18, 2  ;;  %v459_v53 = vperm.slane %v813_v18, 6 }
  0x1a   : > { %426 = vperm.xlu2 %684, %v359_v7   ;;  %v448_v60 = vperm.slane %v444_v46, 1  ;;  %v449_v61 = vperm.slane %v445_v47, 1  ;;  %v476_v0 = vperm.slane %v472_v50, 3  ;;  %v477_v1 = vperm.slane %v473_v51, 3 }
  0x1f   : > { %685 = vset.pattern.permute.xlu0 %v722_v2  ;;  %v462_v2 = vperm.slane %v458_v52, 2 }
  0x20   : > { %455 = vperm.xlu1 %682, %v359_v7   ;;  %441 = vperm.xlu0 %685, %v359_v7  }
  0x22   : > { %686 = vset.pattern.permute.xlu2 %v724_v4 }
  0x23   : > { %469 = vperm.xlu2 %686, %v359_v7  }
  0x28   : > { %687 = vset.pattern.permute.xlu1 %v723_v3  ;;  %689 = vset.pattern.permute.xlu0 %v723_v3 }
  0x29   : > { %487 = vperm.xlu1 %687, %v484_v8  }
  0x2b   : > { %688 = vset.pattern.permute.xlu2 %v723_v3  ;;  %v463_v3 = vperm.slane %v459_v53, 2 }
  0x2c   : > { %507 = vperm.xlu2 %688, %v504_v9  }
  0x6b   : > { %v412_v11 = vpop.permute.xlu2 %411 }
  0x6c   : > { %v420_v54 = vmul.f32 %v418_v34, %v412_v11  ;;  %v421_v55 = vmul.f32 %v419_v35, %v412_v11 }
  0x74   : > { %v427_v31 = vpop.permute.xlu2 %426 }
  0x75   : > { %v436_v58 = vmul.f32 %v434_v37, %v427_v31  ;;  %v437_v59 = vmul.f32 %v435_v38, %v427_v31 }
  0x7d   : > { %v470_v4 = vpop.permute.xlu2 %469 }
  0x7e   : > { %v478_v11 = vmul.f32 %v476_v0, %v470_v4  ;;  %v479_v12 = vmul.f32 %v477_v1, %v470_v4 }
  0x81   : > { %v369_v14 = vpop.permute.xlu0 %368  ;;  %v384_v15 = vpop.permute.xlu1 %383 }
  0x82   : > { %v378_v32 = vmul.f32 %v376_v21, %v369_v14  ;;  %v379_v33 = vmul.f32 %v377_v22, %v369_v14  ;;  %v392_v39 = vmul.f32 %v390_v27, %v384_v15  ;;  %v393_v40 = vmul.f32 %v391_v28, %v384_v15 }
  0x89   : > { %v364_v36 = vpop.permute.xlu0 %363 }
  0x8a   : > { %v380_v41 = vadd.f32 %v378_v32, %v364_v36  ;;  %v381_v42 = vadd.f32 %v379_v33, %v364_v36  ;;  %v398_v43 = vpop.permute.xlu1 %397  ;;  %v508_v33 = vpop.permute.xlu2 %507 }
  0x8b   : > { %v406_v44 = vmul.f32 %v404_v29, %v398_v43  ;;  %v407_v45 = vmul.f32 %v405_v30, %v398_v43  ;;  %v510_v38 = vperm.slane %v508_v33, 0 }
  0x8c   : > { %v394_v48 = vadd.f32 %v392_v39, %v380_v41  ;;  %v395_v49 = vadd.f32 %v393_v40, %v381_v42 }
  0x8e   : > { %v408_v56 = vadd.f32 %v406_v44, %v394_v48  ;;  %v409_v57 = vadd.f32 %v407_v45, %v395_v49 }
  0x90   : > { %v422_v62 = vadd.f32 %v420_v54, %v408_v56  ;;  %v423_v63 = vadd.f32 %v421_v55, %v409_v57 }
  0x92   : > { %v438_v5 = vadd.f32 %v436_v58, %v422_v62  ;;  %v439_v6 = vadd.f32 %v437_v59, %v423_v63  ;;  %v456_v7 = vpop.permute.xlu1 %455  ;;  %v442_v8 = vpop.permute.xlu0 %441 }
  0x93   : > { %v450_v9 = vmul.f32 %v448_v60, %v442_v8  ;;  %v451_v10 = vmul.f32 %v449_v61, %v442_v8  ;;  %v464_v13 = vmul.f32 %v462_v2, %v456_v7  ;;  %v465_v14 = vmul.f32 %v463_v3, %v456_v7 }
  0x95   : > { %v452_v15 = vadd.f32 %v450_v9, %v438_v5  ;;  %v453_v16 = vadd.f32 %v451_v10, %v439_v6 }
  0x97   : > { %v466_v17 = vadd.f32 %v464_v13, %v452_v15  ;;  %v467_v19 = vadd.f32 %v465_v14, %v453_v16 }
  0x99   : > { %v480_v20 = vadd.f32 %v478_v11, %v466_v17  ;;  %v481_v21 = vadd.f32 %v479_v12, %v467_v19 }
  0x9b   : > { %v488_v22 = vpop.permute.xlu1 %487  ;;  %v482_v23 = vmax.f32 %v480_v20, 0.0  ;;  %v483_v24 = vmax.f32 %v481_v21, 0.0 }
  0x9d   : > { %v490_v25 = vmul.f32 %v488_v22, %v482_v23  ;;  %v491_v26 = vmul.f32 %v488_v22, %v483_v24 }
  0x9f   : > { %v492_v27 = vrot.slane %v490_v25, 4  ;;  %v498_v28 = vrot.slane %v491_v26, 4 }
  0xa1   : > { %v493_v29 = vadd.f32 %v492_v27, %v490_v25  ;;  %v499_v30 = vadd.f32 %v498_v28, %v491_v26 }
  0xa3   : > { %v494_v31 = vrot.slane %v493_v29, 2  ;;  %v500_v32 = vrot.slane %v499_v30, 2 }
  0xa5   : > { %v495_v34 = vadd.f32 %v494_v31, %v493_v29  ;;  %v501_v35 = vadd.f32 %v500_v32, %v499_v30 }
  0xa7   : > { %v496_v36 = vrot.slane %v495_v34, 1  ;;  %v502_v37 = vrot.slane %v501_v35, 1 }
  0xa9   : > { %v497_v39 = vadd.f32 %v496_v36, %v495_v34  ;;  %v503_v40 = vadd.f32 %v502_v37, %v501_v35 }
  0xab   : > { %v511_v41 = vadd.f32 %v510_v38, %v497_v39  ;;  %v512_v42 = vadd.f32 %v510_v38, %v503_v40 }
  0xad   : > { %v513_v43 = vsub.f32 0.0, %v511_v41  ;;  %v514_v44 = vsub.f32 0.0, %v512_v42 }
  0xaf   : > { %v515_v45 = vmul.f32 1.442695, %v513_v43  ;;  %v517_v46 = vmul.f32 1.442695, %v514_v44 }
  0xb1   : > { %690 = vpow2.f32 %v515_v45 }
  0xb2   : > { %692 = vpow2.f32 %v517_v46 }
  0xb7   : > { %v691_v47 = vpop.eup %690 }
  0xb8   : > { %v693_v48 = vpop.eup %692  ;;  %v519_v49 = vadd.f32 1.0, %v691_v47 }
  0xb9   : > { %v520_v50 = vadd.f32 1.0, %v693_v48 }
  0xbb   : > { %694 = vrcp.f32 %v520_v50 }
  0xbc   : > { %696 = vrcp.f32 %v519_v49 }
  0xc1   : > { %v695_v51 = vpop.eup %694 }
  0xc2   : > { %v525_v52 = vrot.slane %v695_v51, 4  ;;  %v697_v53 = vpop.eup %696 }
  0xc4   : > { %v527_v54 = vsel %vm526_vm0, %v697_v53, %v525_v52 }
  0xc5   : > { %v529_v55 = vmul.f32 %v527_v54, %v813_v18 }
  0xc7   : > { %530 = vst [vmem:[%s354_s23] sm:$0xff] %v529_v55 }
  0xc8 PF: > { %s19_s28 = sadd.s32 1, %s720_s28   ;;  %s845_s26 = smov %s716_s27 }
  0xc9   : > { %p16_p5 = scmp.ge.s32.totalorder %s19_s28, 4   ;;  %s846_s27 = smov %s848_s6 }
  0xcb   :  { %18 = sbr.rel (!%p16_p5) target bundleno = 3 (0x3), region = 81 }

</bundles_post_ra>
